<compile_context>
chip_gen: v5e
topology: v5e:2x2
jax: 0.10.0
libtpu: 0.0.40
codegen_flags: <defaults>
</compile_context>

<pallas_src>
import functools
import math

import jax
import jax.numpy as jnp
from jax.experimental import pallas as pl
from jax.experimental.pallas import tpu as pltpu


def _round_up(a: int, b: int) -> int:
    return ((a + b - 1) // b) * b


def _vmem_cap_bytes() -> int:
    """Physical VMEM per core (128 MiB v5e/v6e, 64 MiB v7x); safe fallback."""
    try:
        cap = getattr(pltpu.get_tpu_info(), "vmem_capacity_bytes", None)
        if cap:
            return int(cap)
    except Exception:
        pass
    return 64 * 1024 * 1024


# --------------------- kernel 1: fused multi-head attention ------------------
def _mha_kernel(*refs, num_heads, head_dim, has_mask):
    if has_mask:
        x_ref, wqkv_ref, bqkv_ref, mask_ref, o_ref = refs
    else:
        x_ref, wqkv_ref, bqkv_ref, o_ref = refs
        mask_ref = None
    cdt = wqkv_ref.dtype
    d_model = num_heads * head_dim

    x = x_ref[0]                                              # [S, d_model]
    # One full-width QKV projection (Q columns already scaled by 1/sqrt(d_k)).
    qkv = jnp.dot(x, wqkv_ref[...],
                  preferred_element_type=jnp.float32) + bqkv_ref[...]

    outs = []
    for h in range(num_heads):                 # unrolled, static lane slices
        lo = h * head_dim
        hi = lo + head_dim
        q = qkv[:, lo:hi]
        k = qkv[:, d_model + lo:d_model + hi]
        v = qkv[:, 2 * d_model + lo:2 * d_model + hi]
        # scores = q @ k^T   (contract over head_dim, no transpose op)
        scores = jax.lax.dot_general(q.astype(cdt), k.astype(cdt),
                                     (((1,), (1,)), ((), ())),
                                     preferred_element_type=jnp.float32)
        if has_mask:
            scores = scores + mask_ref[...]
        m = jnp.max(scores, axis=-1, keepdims=True)
        e = jnp.exp(scores - m)
        denom = jnp.sum(e, axis=-1, keepdims=True)
        attn = e * pl.reciprocal(denom, approx=True)          # EUP, not VALU
        outs.append(jnp.dot(attn.astype(cdt), v.astype(cdt),
                            preferred_element_type=jnp.float32))
    # Lane-dense single store in torch's (B, S, H*hd) layout.
    o_ref[0] = jnp.concatenate(outs, axis=-1).astype(o_ref.dtype)


# --------------------- kernel 2: out-proj + LN + FFN + LN --------------------
def _layer_norm(h, gamma, beta, eps):
    mean = jnp.mean(h, axis=-1, keepdims=True)
    var = jnp.mean(jnp.square(h - mean), axis=-1, keepdims=True)
    return (h - mean) * jax.lax.rsqrt(var + eps) * gamma + beta


def _encoder_tail_kernel(vals_ref, x_ref, wo_ref, w1_ref, b1_ref, w2_ref,
                         c_ref, o_ref, *, eps):
    c = c_ref[...]               # (6, d_model) f32: b_o, g0, be0, b2, g1, be1
    b_o, g0, be0 = c[0:1], c[1:2], c[2:3]
    b2, g1, be1 = c[3:4], c[4:5], c[5:6]

    # attention output projection (MXU operands in weight dtype, f32 accumulate)
    attn = jnp.dot(vals_ref[...].astype(wo_ref.dtype), wo_ref[...],
                   preferred_element_type=jnp.float32) + b_o
    # residual (f32 x) + first LayerNorm
    h1 = attn + x_ref[...].astype(jnp.float32)
    ln1 = _layer_norm(h1, g0, be0, eps)
    # FFN: fc1 -> ReLU -> dropout -> fc2
    # TODO(synk): nn.Dropout(p=0.3) is identity in eval mode; training-mode
    # stochastic masking (exact torch RNG) is not reproduced here.
    h = jnp.dot(ln1.astype(w1_ref.dtype), w1_ref[...],
                preferred_element_type=jnp.float32) + b1_ref[...]
    h = jnp.maximum(h, 0.0)
    ff = jnp.dot(h.astype(w2_ref.dtype), w2_ref[...],
                 preferred_element_type=jnp.float32) + b2
    # residual + second LayerNorm
    o_ref[...] = _layer_norm(ff + ln1, g1, be1, eps).astype(o_ref.dtype)


# --------------------------------- wrapper -----------------------------------
def encoder_layer(x, params, attention_mask=None, *,
                  compute_dtype=jnp.bfloat16, tm_max=None, eps=1e-5):
    """EncoderLayer forward. x: [B, S, d_model].

    compute_dtype: MXU operand dtype (default bf16; accumulation, softmax,
    residuals and LayerNorms stay in float32).  Pass jnp.float32 for a
    full-precision path.
    """
    B, S, d_model = x.shape
    H = int(params["num_heads"])
    assert d_model % H == 0
    hd = d_model // H
    hidden = params["w1"].shape[1]
    out_dtype = x.dtype

    cdt = jnp.dtype(compute_dtype) if compute_dtype is not None else jnp.dtype(x.dtype)
    wcast = lambda a: jnp.asarray(a, cdt)
    f32 = lambda a: jnp.asarray(a, jnp.float32)
    witem = cdt.itemsize
    xitem = jnp.dtype(x.dtype).itemsize
    oitem = jnp.dtype(out_dtype).itemsize
    cap = _vmem_cap_bytes()

    # ---- QKV weight regroup: columns become [Q_all | K_all | V_all] (head
    # major, matching torch's reshape(B,S,H,3*hd)+chunk), with 1/sqrt(d_k)
    # folded into the Q projection (no per-score scale in-kernel).
    inv_sqrt = 1.0 / math.sqrt(hd)
    w4 = f32(params["w_qkv"]).reshape(d_model, H, 3, hd)
    b4 = f32(params["b_qkv"]).reshape(H, 3, hd)
    wq = w4[:, :, 0, :].reshape(d_model, d_model) * inv_sqrt
    wk = w4[:, :, 1, :].reshape(d_model, d_model)
    wv = w4[:, :, 2, :].reshape(d_model, d_model)
    w_qkv = wcast(jnp.concatenate([wq, wk, wv], axis=1))        # [d, 3d]
    b_qkv = jnp.concatenate([b4[:, 0, :].reshape(d_model) * inv_sqrt,
                             b4[:, 1, :].reshape(d_model),
                             b4[:, 2, :].reshape(d_model)]).reshape(1, 3 * d_model)

    x_c = wcast(x)
    has_mask = attention_mask is not None
    operands = [x_c, w_qkv, b_qkv]
    in_specs = [
        pl.BlockSpec((1, S, d_model), lambda b: (b, 0, 0)),                 # x
        pl.BlockSpec((d_model, 3 * d_model), lambda b: (0, 0),
                     pipeline_mode=pl.Buffered(1)),                        # W_qkv (resident)
        pl.BlockSpec((1, 3 * d_model), lambda b: (0, 0),
                     pipeline_mode=pl.Buffered(1)),                        # b_qkv
    ]
    if has_mask:
        # TODO(synk): only a shared additive [S, S] mask is wired; per-batch /
        # per-head key-padding masks are not supported here.
        mask = jnp.broadcast_to(jnp.asarray(attention_mask, jnp.float32), (S, S))
        operands.append(mask)
        in_specs.append(pl.BlockSpec((S, S), lambda b: (0, 0),
                                     pipeline_mode=pl.Buffered(1)))

    # VMEM: resident W/b(/mask) + double-buffered x/out tiles + f32 intermediates.
    # TODO(synk): full [S, S] f32 scores per head; for long sequences switch to
    # an online-softmax (flash) KV grid axis instead.
    att_est = (3 * d_model * d_model * witem + 3 * d_model * 4
               + (S * S * 4 if has_mask else 0)
               + 2 * S * d_model * (witem + witem)
               + S * 3 * d_model * 4 + 2 * S * S * 4 + S * d_model * 4)
    att_vmem = int(min(cap * 9 // 10, max(2 * att_est, 32 * 1024 * 1024)))

    mha_flops = int(B * (2 * S * d_model * 3 * d_model + H * 4 * S * S * hd))
    mha_bytes = int(B * S * d_model * (witem + witem)
                    + 3 * d_model * d_model * witem + 3 * d_model * 4
                    + (S * S * 4 if has_mask else 0))

    # TODO(synk): with batch=1 on v7x (2 TensorCores) this (B,)-grid leaves one
    # core idle; a query-row grid axis would be needed for that case.
    values = pl.pallas_call(
        functools.partial(_mha_kernel, num_heads=H, head_dim=hd, has_mask=has_mask),
        out_shape=jax.ShapeDtypeStruct((B, S, d_model), cdt),
        grid_spec=pltpu.PrefetchScalarGridSpec(
            num_scalar_prefetch=0,
            grid=(B,),
            in_specs=in_specs,
            out_specs=pl.BlockSpec((1, S, d_model), lambda b: (b, 0, 0)),
        ),
        compiler_params=pltpu.CompilerParams(
            dimension_semantics=("parallel",),
            vmem_limit_bytes=att_vmem),
        cost_estimate=pl.CostEstimate(flops=mha_flops,
                                      transcendentals=int(B * H * (S * S + S)),
                                      bytes_accessed=mha_bytes),
    )(*operands)

    # ---- kernel 2: row-tiled tail over the flattened activations (free reshapes,
    # no transpose, no host-side padding; residual stream stays in x's dtype).
    N = B * S
    vals = values.reshape(N, d_model)
    x2 = x.reshape(N, d_model)

    wo = wcast(params["w_o"])
    w1 = wcast(params["w1"])
    w2 = wcast(params["w2"])
    b1_r = f32(params["b1"]).reshape(1, hidden)
    consts = jnp.stack([f32(params["b_o"]), f32(params["gamma0"]), f32(params["beta0"]),
                        f32(params["b2"]), f32(params["gamma1"]), f32(params["beta1"])],
                       axis=0)                                  # (6, d_model)

    resident = ((d_model * d_model + 2 * d_model * hidden) * witem
                + (6 * d_model + hidden) * 4)

    def tail_vmem(tm_):
        tiles = 2 * tm_ * d_model * (witem + xitem + oitem)     # double-buffered
        interm = 5 * tm_ * d_model * 4 + tm_ * hidden * 4       # f32 temporaries
        return resident + tiles + interm

    budget = cap * 7 // 10
    if N % 8 != 0:
        tm = N                        # single full block for tiny / ragged N
    else:
        tm_cap = tm_max if tm_max is not None else (512 if cap >= 96 * 1024 * 1024 else 256)
        tm = max(8, min(_round_up(tm_cap, 8), N))
        while tm > 8 and tail_vmem(tm) > budget:
            tm = max(8, (tm // 2 // 8) * 8)
    grid_rows = pl.cdiv(N, tm)
    tail_limit = int(min(cap * 9 // 10, max(2 * tail_vmem(tm), 32 * 1024 * 1024)))

    def const_spec(shape):
        return pl.BlockSpec(shape, lambda i: (0, 0), pipeline_mode=pl.Buffered(1))

    tail_flops = int(2 * N * d_model * d_model + 4 * N * d_model * hidden
                     + 16 * N * d_model)
    tail_bytes = int(N * d_model * (witem + xitem + oitem) + resident)

    out = pl.pallas_call(
        functools.partial(_encoder_tail_kernel, eps=eps),
        out_shape=jax.ShapeDtypeStruct((N, d_model), out_dtype),
        grid_spec=pltpu.PrefetchScalarGridSpec(
            num_scalar_prefetch=0,
            grid=(grid_rows,),
            in_specs=[
                pl.BlockSpec((tm, d_model), lambda i: (i, 0)),   # attention values
                pl.BlockSpec((tm, d_model), lambda i: (i, 0)),   # residual x (f32)
                const_spec((d_model, d_model)),                  # W_o
                const_spec((d_model, hidden)),                   # W1
                const_spec((1, hidden)),                         # b1
                const_spec((hidden, d_model)),                   # W2
                const_spec((6, d_model)),                        # b_o,g0,be0,b2,g1,be1
            ],
            out_specs=pl.BlockSpec((tm, d_model), lambda i: (i, 0)),
        ),
        compiler_params=pltpu.CompilerParams(
            dimension_semantics=("parallel",),
            vmem_limit_bytes=tail_limit),
        cost_estimate=pl.CostEstimate(flops=tail_flops,
                                      transcendentals=int(2 * N),
                                      bytes_accessed=tail_bytes),
    )(vals, x2, wo, w1, b1_r, w2, consts)

    return out.reshape(B, S, d_model)


# ------------------------------ pure-JAX reference ---------------------------
def _layer_norm_ref(x, gamma, beta, eps=1e-5):
    mean = jnp.mean(x, axis=-1, keepdims=True)
    var = jnp.mean((x - mean) ** 2, axis=-1, keepdims=True)
    return gamma * (x - mean) / jnp.sqrt(var + eps) + beta


def encoder_layer_ref(x, params, attention_mask=None, eps=1e-5):
    B, S, d_model = x.shape
    H = int(params["num_heads"])
    hd = d_model // H
    qkv = x @ params["w_qkv"] + params["b_qkv"]
    qkv = qkv.reshape(B, S, H, 3 * hd).transpose(0, 2, 1, 3)
    q, k, v = qkv[..., :hd], qkv[..., hd:2 * hd], qkv[..., 2 * hd:]
    scaled = jnp.einsum("bhsd,bhtd->bhst", q, k) * (1.0 / math.sqrt(hd))
    if attention_mask is not None:
        scaled = scaled + attention_mask
    attn = jax.nn.softmax(scaled, axis=-1)
    values = jnp.einsum("bhst,bhtd->bhsd", attn, v)
    values = values.transpose(0, 2, 1, 3).reshape(B, S, d_model)
    attn_out = values @ params["w_o"] + params["b_o"]
    ln1 = _layer_norm_ref(attn_out + x, params["gamma0"], params["beta0"], eps)
    h = jax.nn.relu(ln1 @ params["w1"] + params["b1"])
    ff = h @ params["w2"] + params["b2"]
    return _layer_norm_ref(ff + ln1, params["gamma1"], params["beta1"], eps)


if __name__ == "__main__":
    d_model, num_heads, hidden = 128, 4, 256   # FeedForwardLayer(d_model, 256)
    batch, seq = 2, 8

    key = jax.random.PRNGKey(0)
    keys = jax.random.split(key, 12)

    def linear_init(kw, kb, fan_in, shape_w, shape_b):
        bound = 1.0 / math.sqrt(fan_in)
        w = jax.random.uniform(kw, shape_w, jnp.float32, -bound, bound)
        b = jax.random.uniform(kb, shape_b, jnp.float32, -bound, bound)
        return w, b

    x = jax.random.normal(keys[0], (batch, seq, d_model), jnp.float32)
    w_qkv, b_qkv = linear_init(keys[1], keys[2], d_model,
                               (d_model, 3 * d_model), (3 * d_model,))
    w_o, b_o = linear_init(keys[3], keys[4], d_model,
                           (d_model, d_model), (d_model,))
    w1, b1 = linear_init(keys[5], keys[6], d_model, (d_model, hidden), (hidden,))
    w2, b2 = linear_init(keys[7], keys[8], hidden, (hidden, d_model), (d_model,))
    gamma0 = 1.0 + 0.1 * jax.random.normal(keys[9], (d_model,), jnp.float32)
    beta0 = 0.1 * jax.random.normal(keys[10], (d_model,), jnp.float32)
    gamma1 = 1.0 + 0.05 * jax.random.normal(keys[11], (d_model,), jnp.float32)
    beta1 = jnp.zeros((d_model,), jnp.float32)

    params = dict(num_heads=num_heads, w_qkv=w_qkv, b_qkv=b_qkv, w_o=w_o, b_o=b_o,
                  gamma0=gamma0, beta0=beta0, w1=w1, b1=b1, w2=w2, b2=b2,
                  gamma1=gamma1, beta1=beta1)

    ref = encoder_layer_ref(x, params, attention_mask=None)

    # default path: bf16 MXU operands, f32 accumulation / softmax / LayerNorm
    y = encoder_layer(x, params, attention_mask=None)
    jax.block_until_ready(y)
    assert y.shape == (batch, seq, d_model)
    err_bf16 = float(jnp.max(jnp.abs(y.astype(jnp.float32) - ref)))
    assert err_bf16 < 0.25, f"bf16 mismatch {err_bf16}"

    # f32-operand path (tolerance leaves margin for the approx EUP reciprocal)
    y32 = encoder_layer(x, params, attention_mask=None, compute_dtype=jnp.float32)
    jax.block_until_ready(y32)
    err32 = float(jnp.max(jnp.abs(y32 - ref)))
    assert bool(jnp.allclose(y32, ref, atol=5e-3, rtol=5e-3)), f"f32 mismatch {err32}"

    # masked path: shared additive [S, S] (causal) mask
    causal = jnp.where(jnp.tril(jnp.ones((seq, seq), dtype=bool)), 0.0, -1e9)
    causal = causal.astype(jnp.float32)
    ref_m = encoder_layer_ref(x, params, attention_mask=causal)
    y_m = encoder_layer(x, params, attention_mask=causal, compute_dtype=jnp.float32)
    jax.block_until_ready(y_m)
    err_m = float(jnp.max(jnp.abs(y_m - ref_m)))
    assert bool(jnp.allclose(y_m, ref_m, atol=5e-3, rtol=5e-3)), f"masked mismatch {err_m}"

    print("KERNEL_OK")
</pallas_src>

<mosaic_0001>
module attributes {stable_mosaic.version = 11 : i64} {
  func.func @_mha_kernel(%arg0: i32, %arg1: memref<1x8x128xbf16, #tpu.memory_space<vmem>>, %arg2: memref<128x384xbf16, #tpu.memory_space<vmem>>, %arg3: memref<1x384xf32, #tpu.memory_space<vmem>>, %arg4: memref<1x8x128xbf16, #tpu.memory_space<vmem>>) attributes {dimension_semantics = [#tpu.dimension_semantics<parallel>], iteration_bounds = array<i64: 2>, scalar_prefetch = 0 : i64, scratch_operands = 0 : i64, tpu.core_type = #tpu.core_type<tc>, window_params = [{transform_indices = @transform_0, window_bounds = array<i64: 1, 8, 128>}, {pipeline_mode = #tpu.pipeline_mode<synchronous>, transform_indices = @transform_1, window_bounds = array<i64: 128, 384>}, {pipeline_mode = #tpu.pipeline_mode<synchronous>, transform_indices = @transform_2, window_bounds = array<i64: 1, 384>}, {transform_indices = @transform_3, window_bounds = array<i64: 1, 8, 128>}]} {
    %c0 = arith.constant 0 : index
    %c0_0 = arith.constant 0 : index
    %c0_1 = arith.constant 0 : index
    %0 = vector.load %arg1[%c0, %c0_0, %c0_1] : memref<1x8x128xbf16, #tpu.memory_space<vmem>>, vector<1x8x128xbf16>
    %1 = vector.shape_cast %0 : vector<1x8x128xbf16> to vector<8x128xbf16>
    %c0_2 = arith.constant 0 : index
    %c0_3 = arith.constant 0 : index
    %2 = vector.load %arg2[%c0_2, %c0_3] : memref<128x384xbf16, #tpu.memory_space<vmem>>, vector<128x384xbf16>
    %cst = arith.constant dense<0.000000e+00> : vector<8x384xf32>
    %3 = tpu.matmul %1, %2, %cst {dimension_numbers = #tpu.dot_dimension_numbers<[1], [0], [0], [1], [0, 0, 1, 1], [], []>} : vector<8x128xbf16>, vector<128x384xbf16>, vector<8x384xf32> -> vector<8x384xf32>
    %c0_4 = arith.constant 0 : index
    %c0_5 = arith.constant 0 : index
    %4 = vector.load %arg3[%c0_4, %c0_5] : memref<1x384xf32, #tpu.memory_space<vmem>>, vector<1x384xf32>
    %5 = vector.broadcast %4 : vector<1x384xf32> to vector<8x384xf32>
    %6 = arith.addf %3, %5 : vector<8x384xf32>
    %7 = vector.extract_strided_slice %6 {offsets = [0, 0], sizes = [8, 32], strides = [1, 1]} : vector<8x384xf32> to vector<8x32xf32>
    %8 = vector.extract_strided_slice %6 {offsets = [0, 128], sizes = [8, 32], strides = [1, 1]} : vector<8x384xf32> to vector<8x32xf32>
    %9 = vector.extract_strided_slice %6 {offsets = [0, 256], sizes = [8, 32], strides = [1, 1]} : vector<8x384xf32> to vector<8x32xf32>
    %10 = arith.truncf %7 : vector<8x32xf32> to vector<8x32xbf16>
    %11 = arith.truncf %8 : vector<8x32xf32> to vector<8x32xbf16>
    %cst_6 = arith.constant dense<0.000000e+00> : vector<8x8xf32>
    %12 = tpu.matmul %10, %11, %cst_6 {dimension_numbers = #tpu.dot_dimension_numbers<[1], [1], [0], [0], [0, 0, 1, 0], [], []>} : vector<8x32xbf16>, vector<8x32xbf16>, vector<8x8xf32> -> vector<8x8xf32>
    %cst_7 = arith.constant dense<0xFF800000> : vector<8xf32>
    %13 = vector.multi_reduction <maximumf>, %12, %cst_7 [1] : vector<8x8xf32> to vector<8xf32>
    %14 = vector.shape_cast %13 : vector<8xf32> to vector<8x1xf32>
    %15 = vector.broadcast %14 : vector<8x1xf32> to vector<8x8xf32>
    %16 = arith.subf %12, %15 : vector<8x8xf32>
    %17 = math.exp %16 : vector<8x8xf32>
    %cst_8 = arith.constant dense<0.000000e+00> : vector<8xf32>
    %18 = vector.multi_reduction <add>, %17, %cst_8 [1] : vector<8x8xf32> to vector<8xf32>
    %19 = vector.shape_cast %18 : vector<8xf32> to vector<8x1xf32>
    %20 = tpu.reciprocal %19 {approx = true} : vector<8x1xf32> -> vector<8x1xf32>
    %21 = vector.broadcast %20 : vector<8x1xf32> to vector<8x8xf32>
    %22 = arith.mulf %17, %21 : vector<8x8xf32>
    %23 = arith.truncf %22 : vector<8x8xf32> to vector<8x8xbf16>
    %24 = arith.truncf %9 : vector<8x32xf32> to vector<8x32xbf16>
    %cst_9 = arith.constant dense<0.000000e+00> : vector<8x32xf32>
    %25 = tpu.matmul %23, %24, %cst_9 {dimension_numbers = #tpu.dot_dimension_numbers<[1], [0], [0], [1], [0, 0, 1, 1], [], []>} : vector<8x8xbf16>, vector<8x32xbf16>, vector<8x32xf32> -> vector<8x32xf32>
    %26 = vector.extract_strided_slice %6 {offsets = [0, 32], sizes = [8, 32], strides = [1, 1]} : vector<8x384xf32> to vector<8x32xf32>
    %27 = vector.extract_strided_slice %6 {offsets = [0, 160], sizes = [8, 32], strides = [1, 1]} : vector<8x384xf32> to vector<8x32xf32>
    %28 = vector.extract_strided_slice %6 {offsets = [0, 288], sizes = [8, 32], strides = [1, 1]} : vector<8x384xf32> to vector<8x32xf32>
    %29 = arith.truncf %26 : vector<8x32xf32> to vector<8x32xbf16>
    %30 = arith.truncf %27 : vector<8x32xf32> to vector<8x32xbf16>
    %cst_10 = arith.constant dense<0.000000e+00> : vector<8x8xf32>
    %31 = tpu.matmul %29, %30, %cst_10 {dimension_numbers = #tpu.dot_dimension_numbers<[1], [1], [0], [0], [0, 0, 1, 0], [], []>} : vector<8x32xbf16>, vector<8x32xbf16>, vector<8x8xf32> -> vector<8x8xf32>
    %cst_11 = arith.constant dense<0xFF800000> : vector<8xf32>
    %32 = vector.multi_reduction <maximumf>, %31, %cst_11 [1] : vector<8x8xf32> to vector<8xf32>
    %33 = vector.shape_cast %32 : vector<8xf32> to vector<8x1xf32>
    %34 = vector.broadcast %33 : vector<8x1xf32> to vector<8x8xf32>
    %35 = arith.subf %31, %34 : vector<8x8xf32>
    %36 = math.exp %35 : vector<8x8xf32>
    %cst_12 = arith.constant dense<0.000000e+00> : vector<8xf32>
    %37 = vector.multi_reduction <add>, %36, %cst_12 [1] : vector<8x8xf32> to vector<8xf32>
    %38 = vector.shape_cast %37 : vector<8xf32> to vector<8x1xf32>
    %39 = tpu.reciprocal %38 {approx = true} : vector<8x1xf32> -> vector<8x1xf32>
    %40 = vector.broadcast %39 : vector<8x1xf32> to vector<8x8xf32>
    %41 = arith.mulf %36, %40 : vector<8x8xf32>
    %42 = arith.truncf %41 : vector<8x8xf32> to vector<8x8xbf16>
    %43 = arith.truncf %28 : vector<8x32xf32> to vector<8x32xbf16>
    %cst_13 = arith.constant dense<0.000000e+00> : vector<8x32xf32>
    %44 = tpu.matmul %42, %43, %cst_13 {dimension_numbers = #tpu.dot_dimension_numbers<[1], [0], [0], [1], [0, 0, 1, 1], [], []>} : vector<8x8xbf16>, vector<8x32xbf16>, vector<8x32xf32> -> vector<8x32xf32>
    %45 = vector.extract_strided_slice %6 {offsets = [0, 64], sizes = [8, 32], strides = [1, 1]} : vector<8x384xf32> to vector<8x32xf32>
    %46 = vector.extract_strided_slice %6 {offsets = [0, 192], sizes = [8, 32], strides = [1, 1]} : vector<8x384xf32> to vector<8x32xf32>
    %47 = vector.extract_strided_slice %6 {offsets = [0, 320], sizes = [8, 32], strides = [1, 1]} : vector<8x384xf32> to vector<8x32xf32>
    %48 = arith.truncf %45 : vector<8x32xf32> to vector<8x32xbf16>
    %49 = arith.truncf %46 : vector<8x32xf32> to vector<8x32xbf16>
    %cst_14 = arith.constant dense<0.000000e+00> : vector<8x8xf32>
    %50 = tpu.matmul %48, %49, %cst_14 {dimension_numbers = #tpu.dot_dimension_numbers<[1], [1], [0], [0], [0, 0, 1, 0], [], []>} : vector<8x32xbf16>, vector<8x32xbf16>, vector<8x8xf32> -> vector<8x8xf32>
    %cst_15 = arith.constant dense<0xFF800000> : vector<8xf32>
    %51 = vector.multi_reduction <maximumf>, %50, %cst_15 [1] : vector<8x8xf32> to vector<8xf32>
    %52 = vector.shape_cast %51 : vector<8xf32> to vector<8x1xf32>
    %53 = vector.broadcast %52 : vector<8x1xf32> to vector<8x8xf32>
    %54 = arith.subf %50, %53 : vector<8x8xf32>
    %55 = math.exp %54 : vector<8x8xf32>
    %cst_16 = arith.constant dense<0.000000e+00> : vector<8xf32>
    %56 = vector.multi_reduction <add>, %55, %cst_16 [1] : vector<8x8xf32> to vector<8xf32>
    %57 = vector.shape_cast %56 : vector<8xf32> to vector<8x1xf32>
    %58 = tpu.reciprocal %57 {approx = true} : vector<8x1xf32> -> vector<8x1xf32>
    %59 = vector.broadcast %58 : vector<8x1xf32> to vector<8x8xf32>
    %60 = arith.mulf %55, %59 : vector<8x8xf32>
    %61 = arith.truncf %60 : vector<8x8xf32> to vector<8x8xbf16>
    %62 = arith.truncf %47 : vector<8x32xf32> to vector<8x32xbf16>
    %cst_17 = arith.constant dense<0.000000e+00> : vector<8x32xf32>
    %63 = tpu.matmul %61, %62, %cst_17 {dimension_numbers = #tpu.dot_dimension_numbers<[1], [0], [0], [1], [0, 0, 1, 1], [], []>} : vector<8x8xbf16>, vector<8x32xbf16>, vector<8x32xf32> -> vector<8x32xf32>
    %64 = vector.extract_strided_slice %6 {offsets = [0, 96], sizes = [8, 32], strides = [1, 1]} : vector<8x384xf32> to vector<8x32xf32>
    %65 = vector.extract_strided_slice %6 {offsets = [0, 224], sizes = [8, 32], strides = [1, 1]} : vector<8x384xf32> to vector<8x32xf32>
    %66 = vector.extract_strided_slice %6 {offsets = [0, 352], sizes = [8, 32], strides = [1, 1]} : vector<8x384xf32> to vector<8x32xf32>
    %67 = arith.truncf %64 : vector<8x32xf32> to vector<8x32xbf16>
    %68 = arith.truncf %65 : vector<8x32xf32> to vector<8x32xbf16>
    %cst_18 = arith.constant dense<0.000000e+00> : vector<8x8xf32>
    %69 = tpu.matmul %67, %68, %cst_18 {dimension_numbers = #tpu.dot_dimension_numbers<[1], [1], [0], [0], [0, 0, 1, 0], [], []>} : vector<8x32xbf16>, vector<8x32xbf16>, vector<8x8xf32> -> vector<8x8xf32>
    %cst_19 = arith.constant dense<0xFF800000> : vector<8xf32>
    %70 = vector.multi_reduction <maximumf>, %69, %cst_19 [1] : vector<8x8xf32> to vector<8xf32>
    %71 = vector.shape_cast %70 : vector<8xf32> to vector<8x1xf32>
    %72 = vector.broadcast %71 : vector<8x1xf32> to vector<8x8xf32>
    %73 = arith.subf %69, %72 : vector<8x8xf32>
    %74 = math.exp %73 : vector<8x8xf32>
    %cst_20 = arith.constant dense<0.000000e+00> : vector<8xf32>
    %75 = vector.multi_reduction <add>, %74, %cst_20 [1] : vector<8x8xf32> to vector<8xf32>
    %76 = vector.shape_cast %75 : vector<8xf32> to vector<8x1xf32>
    %77 = tpu.reciprocal %76 {approx = true} : vector<8x1xf32> -> vector<8x1xf32>
    %78 = vector.broadcast %77 : vector<8x1xf32> to vector<8x8xf32>
    %79 = arith.mulf %74, %78 : vector<8x8xf32>
    %80 = arith.truncf %79 : vector<8x8xf32> to vector<8x8xbf16>
    %81 = arith.truncf %66 : vector<8x32xf32> to vector<8x32xbf16>
    %cst_21 = arith.constant dense<0.000000e+00> : vector<8x32xf32>
    %82 = tpu.matmul %80, %81, %cst_21 {dimension_numbers = #tpu.dot_dimension_numbers<[1], [0], [0], [1], [0, 0, 1, 1], [], []>} : vector<8x8xbf16>, vector<8x32xbf16>, vector<8x32xf32> -> vector<8x32xf32>
    %83 = tpu.concatenate %25, %44, %63, %82 in 1 : vector<8x32xf32>, vector<8x32xf32>, vector<8x32xf32>, vector<8x32xf32> -> vector<8x128xf32>
    %84 = arith.truncf %83 : vector<8x128xf32> to vector<8x128xbf16>
    %c0_22 = arith.constant 0 : index
    %c0_23 = arith.constant 0 : index
    %c0_24 = arith.constant 0 : index
    %85 = vector.load %arg4[%c0_22, %c0_23, %c0_24] : memref<1x8x128xbf16, #tpu.memory_space<vmem>>, vector<1x8x128xbf16>
    %86 = vector.shape_cast %85 : vector<1x8x128xbf16> to vector<8x128xbf16>
    %87 = vector.shape_cast %84 : vector<8x128xbf16> to vector<1x8x128xbf16>
    tpu.vector_store %arg4[%c0_22, %c0_23, %c0_24], %87 {strides = array<i32>} : memref<1x8x128xbf16, #tpu.memory_space<vmem>>, vector<1x8x128xbf16>,
    return
  }
  func.func @transform_0(%arg0: i32) -> (i32, i32, i32) {
    %c0_i32 = arith.constant 0 : i32
    %c0_i32_0 = arith.constant 0 : i32
    %c0_i32_1 = arith.constant 0 : i32
    return %arg0, %c0_i32, %c0_i32_0 : i32, i32, i32
  }
  func.func @transform_1(%arg0: i32) -> (i32, i32) {
    %c0_i32 = arith.constant 0 : i32
    %c0_i32_0 = arith.constant 0 : i32
    %c0_i32_1 = arith.constant 0 : i32
    return %c0_i32, %c0_i32_0 : i32, i32
  }
  func.func @transform_2(%arg0: i32) -> (i32, i32) {
    %c0_i32 = arith.constant 0 : i32
    %c0_i32_0 = arith.constant 0 : i32
    %c0_i32_1 = arith.constant 0 : i32
    return %c0_i32, %c0_i32_0 : i32, i32
  }
  func.func @transform_3(%arg0: i32) -> (i32, i32, i32) {
    %c0_i32 = arith.constant 0 : i32
    %c0_i32_0 = arith.constant 0 : i32
    %c0_i32_1 = arith.constant 0 : i32
    return %arg0, %c0_i32, %c0_i32_0 : i32, i32, i32
  }
}

</mosaic_0001>

<bundles_post_ra>
// kernel: tpu_custom_call.1
= control target key start
LH: loop header
LB: loop body
LE: loop exit
PB: predicated region body
PF: predicated region fallthrough
CT: control target
= control target key end

     0   :  { %8 = vsyncpa [#allocation3], 0  ;;  %s1398_s0 = inlined_call_operand.hbm [shape: bf16[2,8,128], index: 0, kind: input, shape index: {}]   ;;  %s1399_s1 = inlined_call_operand.hbm [shape: bf16[128,384], index: 1, kind: input, shape index: {}]   ;;  %s1400_s2 = inlined_call_operand.hbm [shape: f32[1,384], index: 2, kind: input, shape index: {}]   ;;  %s1401_s3 = inlined_call_operand.hbm [shape: bf16[2,8,128], index: 3, kind: output, shape index: {}]  }
   0x1   :  { %10 = vsyncpa [#allocation3 + $0x1], 0 }
   0x2   :  { %11 = vsyncpa [#allocation6], 0 }
   0x3   :  { %12 = vsyncpa [#allocation4], 0 }
   0x4   :  { %14 = vsyncpa [#allocation4 + $0x1], 0  ;;  %s1200_s12 = smov 0   ;;  %s1202_s13 = smov 0  }
   0x5   :  { %s1204_s14 = smov 0   ;;  %s1206_s15 = smov 0  }
   0x6 LB: > { %s130_s18 = sshll.u32 %s1399_s1, 4  ;;  %s1224_s19 = sadd.s32 4294967295, %s1171_s15   ;;  %s1171_s15 = sphi %s1206_s15, %s1412_s15   ;;  %s1167_s14 = sphi %s1204_s14, %s1411_s14   ;;  %s1163_s13 = sphi %s1202_s13, %s1410_s13   ;;  %s1159_s12 = sphi %s1200_s12, %s1409_s12   ;;  %s131_s18 = int_to_ptr.hbm [resolvable:$true] %s130_s18 }
   0x7   : > { %p780_p0 = scmp.ge.s32.totalorder %s1171_s15, 1  ;;  %p41_p1 = scmp.eq.s32.totalorder %s1224_s19, 0 }
   0x8   : > { %p119_p2 = scmp.lt.s32.totalorder %s1171_s15, 3  ;;  %s1173_s21 = smov [#allocation5]  }
   0x9   : > { %s132_s22 = sshll.u32 %s1173_s21, 4  ;;  %s145_s25 = sshll.u32 %s1400_s2, 4  ;;  %s133_s22 = int_to_ptr.vmem [resolvable:$true] %s132_s22  ;;  %s146_s25 = int_to_ptr.hbm [resolvable:$true] %s145_s25 }
   0xa   : > { %p1229_p3 = pnand %p780_p0, %p119_p2  ;;  %s1174_s26 = smov [#allocation7]  }
   0xb   : > { %s147_s27 = sshll.u32 %s1174_s26, 4  ;;  %s1175_s28 = smov 192   ;;  %s148_s27 = int_to_ptr.vmem [resolvable:$true] %s147_s27 }
   0xc   : > { %p935_p4 = pneg %p1229_p3  ;;  %s1176_s29 = smov 12  }
   0xd   : > { %s779_s30 = sadd.s32 4294967294, %s1171_s15   ;;  %s1243_s4 = sadd.s32 1, %s1171_s15  }
   0xe   : > { %p936_p6 = pnand %p935_p4, %p41_p1  ;;  %s24_s5 = ssub.s32 %s1171_s15, %s1243_s4 }
   0xf   : > { %s27_s6 = sadd.s32 1, %s1167_s14  ;;  %p25_p7 = scmp.eq.s32.totalorder %s24_s5, 0 }
  0x10   : > { %938 = dma.hbm_to_vmem [thread:$0]  (!%p936_p6), %s131_s18, 3072, %s133_s22, [#allocation6], %s1175_s28, %s1175_s28, %s1176_s29  }
  0x11   : > { %941 = dma.hbm_to_vmem [thread:$0]  (!%p936_p6), %s146_s25, 48, %s148_s27, [#allocation6]  }
  0x12   : > { %p34_p8 = scmp.ne.s32.totalorder %s1167_s14, %s1163_s13  ;;  %p35_p9 = scmp.eq.s32.totalorder %s1171_s15, 0 }
  0x13   : > { %p40_p10 = scmp.ne.s32.totalorder %s1163_s13, %s1159_s12  ;;  %p106_p13 = scmp.eq.s32.totalorder %s1224_s19, 1 }
  0x14   : > { %s1254_s7 = scalar_select %p25_p7, %s1167_s14, %s27_s6  }
  0x15   : > { %p1256_p11 = por %p35_p9, %p34_p8  ;;  %p1262_p12 = por %p41_p1, %p40_p10 }
  0x16   : > { %p112_p0 = scmp.eq.s32.totalorder %s779_s30, 1  ;;  %p952_p2 = scmp.lt.s32.totalorder %s1171_s15, 2 }
  0x17   : > { %s158_s10 = sand.u32 1, %s1167_s14   ;;  %p1269_p4 = por %p106_p13, %p34_p8 }
  0x18   : > { %p1273_p6 = por %p112_p0, %p40_p10  ;;  %s784_s17 = sshll.u32 %s158_s10, 2 }
  0x19   : > { %s785_s18 = sshll.u32 %s1171_s15, 2  ;;  %s162_s24 = scalar_lea.vmem [#allocation2], %s784_s17 }
  0x1a   : > { %s166_s23 = scalar_lea.hbm %s1398_s0, %s785_s18  ;;  %s170_s25 = sshll.u32 %s162_s24, 4  ;;  %s171_s25 = int_to_ptr.vmem [resolvable:$true] %s170_s25 }
  0x1b   : > { %s168_s26 = sshll.u32 %s166_s23, 4  ;;  %p1283_p7 = pnand %p952_p2, %p1256_p11  ;;  %s169_s26 = int_to_ptr.hbm [resolvable:$true] %s168_s26 }
  0x1c   : > { %s159_s28 = scalar_lea.sflag [#allocation3], %s158_s10  ;;  %s1071_s29 = sshra.s32 %s169_s26, 4  ;;  %s1072_s29 = int_to_ptr.hbm [resolvable:$true] %s1071_s29 }
  0x1d   : > { %s1073_s30 = scalar_lea.hbm %s1072_s29, 4  ;;  %p1075_p9 = pneg %p1283_p7 }
  0x1e   : > { %p1074_p8 = scmp.ne.s32.totalorder %s1072_s29, %s1073_s30  ;;  %s1078_s17 = scalar_lea.hbm %s1398_s0, 8 }
  0x1f   : > { %p1079_p11 = scmp.lt.s32.totalorder %s1072_s29, %s1398_s0  ;;  %p1080_p0 = scmp.lt.s32.totalorder %s1078_s17, %s1073_s30 }
  0x20   : > { %p1076_p10 = pnand %p1075_p9, %p1074_p8 }
  0x21   : > { %p1081_p2 = por %p1080_p0, %p1079_p11 }
  0x22   : > { %p1077_p13 = pneg %p1076_p10 }
  0x24   : > { %p1082_p5 = pnand %p1081_p2, %p1077_p13 }
  0x26   : > { %1085 = shalt.err (!%p1082_p5)
}
  0x27   : > { %945 = dma.hbm_to_vmem [thread:$0]  (!%p1283_p7), %s169_s26, 64, %s171_s25, %s159_s28  }
  0x28   : > { %179 = sbr.rel (%p1229_p3) target bundleno = 1294 (0x50e), region = 32  ;;  %s1300_s10 = sand.u32 (!%p1229_p3), 1, %s1163_s13  }
  0x29   : > { %s787_s21 = sshll.u32 (!%p1229_p3), %s1300_s10, 2  ;;  %s182_s22 = scalar_lea.sflag (!%p1229_p3), [#allocation3], %s1300_s10 }
  0x2a   : > { %s1306_s23 = scalar_lea.vmem (!%p1229_p3), [#allocation2], %s787_s21 }
  0x2d   : > { %1146 = dma.done.wait (%p1262_p12), %s182_s22, 64  }
  0x2e   : > { %1148 = vsyncadd (%p1262_p12), %s182_s22, 4294967232 }
  0x2f   : > { %1150 = dma.done.wait (%p41_p1), [#allocation6], 3120  }
  0x30   : > { %1152 = vsyncadd (%p41_p1), [#allocation6], 4294964176  ;;  %v877_v0 = vld [vmem:[#allocation5 + $0xa8] sm:$0xf]  ;;  %v921_v1 = vld [vmem:[#allocation5 + $0xb0] sm:$0xf0] }
  0x31   : > { %v920_v2 = vld [vmem:[#allocation5 + $0xac] sm:$0xf]  ;;  %v878_v3 = vor.u32 %v921_v1, %v877_v0  ;;  %v879_v4 = vld [vmem:[#allocation5 + $0xb4] sm:$0xf0]  ;;  %v865_v5 = vld [vmem:[#allocation5 + $0x90] sm:$0xf] }
  0x32   : > { %v918_v6 = vld [vmem:[#allocation5 + $0x98] sm:$0xf0]  ;;  %v882_v7 = vor.u32 %v920_v2, %v879_v4  ;;  %v917_v8 = vld [vmem:[#allocation5 + $0x94] sm:$0xf]  ;;  %v867_v9 = vld [vmem:[#allocation5 + $0x9c] sm:$0xf0] }
  0x33   : > { %389 = vmatpush.bf16.msra.mxu0 %v878_v3  ;;  %v866_v10 = vor.u32 %v918_v6, %v865_v5  ;;  %v870_v11 = vor.u32 %v917_v8, %v867_v9  ;;  %v853_v12 = vld [vmem:[#allocation5 + $0x78] sm:$0xf]  ;;  %v915_v13 = vld [vmem:[#allocation5 + $0x80] sm:$0xf0]  ;;  %v914_v14 = vld [vmem:[#allocation5 + $0x7c] sm:$0xf] }
  0x34   : > { %402 = vmatpush.bf16.msra.mxu1 %v882_v7  ;;  %v855_v15 = vld [vmem:[#allocation5 + $0x84] sm:$0xf0]  ;;  %v854_v16 = vor.u32 %v915_v13, %v853_v12  ;;  %v841_v18 = vld [vmem:[#allocation5 + $0x60] sm:$0xf]  ;;  %v912_v19 = vld [vmem:[#allocation5 + $0x68] sm:$0xf0] }
  0x35   : > { %v858_v17 = vor.u32 %v914_v14, %v855_v15  ;;  %v911_v20 = vld [vmem:[#allocation5 + $0x64] sm:$0xf]  ;;  %v843_v21 = vld [vmem:[#allocation5 + $0x6c] sm:$0xf0]  ;;  %v842_v22 = vor.u32 %v912_v19, %v841_v18  ;;  %v922_v24 = vld [vmem:[#allocation5 + $0xb8] sm:$0xf0] }
  0x36   : > { %v885_v23 = vld [vmem:[#allocation5 + $0xb0] sm:$0xf]  ;;  %v873_v25 = vld [vmem:[#allocation5 + $0x98] sm:$0xf]  ;;  %v846_v26 = vor.u32 %v911_v20, %v843_v21  ;;  %v829_v27 = vld [vmem:[#allocation5 + $0x48] sm:$0xf] }
  0x37   : > { %390 = vmatpush.bf16.msra.mxu0 %v866_v10  ;;  %v909_v28 = vld [vmem:[#allocation5 + $0x50] sm:$0xf0]  ;;  %v886_v29 = vor.u32 %v922_v24, %v885_v23  ;;  %v919_v30 = vld [vmem:[#allocation5 + $0xa0] sm:$0xf0]  ;;  %v908_v31 = vld [vmem:[#allocation5 + $0x4c] sm:$0xf] }
  0x38   : > { %403 = vmatpush.bf16.msra.mxu1 %v870_v11  ;;  %v831_v32 = vld [vmem:[#allocation5 + $0x54] sm:$0xf0]  ;;  %v874_v33 = vor.u32 %v919_v30, %v873_v25  ;;  %v830_v34 = vor.u32 %v909_v28, %v829_v27  ;;  %v861_v35 = vld [vmem:[#allocation5 + $0x80] sm:$0xf]  ;;  %v916_v36 = vld [vmem:[#allocation5 + $0x88] sm:$0xf0] }
  0x39   : > { %415 = vmatpush.bf16.msra.mxu2 %v886_v29  ;;  %v834_v37 = vor.u32 %v908_v31, %v831_v32  ;;  %v817_v38 = vld [vmem:[#allocation5 + $0x30] sm:$0xf]  ;;  %v906_v39 = vld [vmem:[#allocation5 + $0x38] sm:$0xf0]  ;;  %v905_v40 = vld [vmem:[#allocation5 + $0x34] sm:$0xf]  ;;  %v862_v42 = vor.u32 %v916_v36, %v861_v35 }
  0x3a   : > { %v819_v41 = vld [vmem:[#allocation5 + $0x3c] sm:$0xf0]  ;;  %v818_v43 = vor.u32 %v906_v39, %v817_v38  ;;  %v849_v44 = vld [vmem:[#allocation5 + $0x68] sm:$0xf]  ;;  %v913_v45 = vld [vmem:[#allocation5 + $0x70] sm:$0xf0] }
  0x3b   : > { %391 = vmatpush.bf16.msra.mxu0 %v854_v16  ;;  %v822_v46 = vor.u32 %v905_v40, %v819_v41  ;;  %v805_v47 = vld [vmem:[#allocation5 + $0x18] sm:$0xf]  ;;  %v903_v48 = vld [vmem:[#allocation5 + $0x20] sm:$0xf0]  ;;  %v902_v49 = vld [vmem:[#allocation5 + $0x1c] sm:$0xf]  ;;  %v850_v51 = vor.u32 %v913_v45, %v849_v44 }
  0x3c   : > { %404 = vmatpush.bf16.msra.mxu1 %v858_v17  ;;  %v807_v50 = vld [vmem:[#allocation5 + $0x24] sm:$0xf0]  ;;  %v806_v52 = vor.u32 %v903_v48, %v805_v47  ;;  %v837_v53 = vld [vmem:[#allocation5 + $0x50] sm:$0xf]  ;;  %v910_v54 = vld [vmem:[#allocation5 + $0x58] sm:$0xf0] }
  0x3d   : > { %416 = vmatpush.bf16.msra.mxu2 %v874_v33  ;;  %v810_v55 = vor.u32 %v902_v49, %v807_v50  ;;  %v793_v56 = vld [vmem:[#allocation5] sm:$0xf]  ;;  %v900_v57 = vld [vmem:[#allocation5 + $0x8] sm:$0xf0]  ;;  %v899_v58 = vld [vmem:[#allocation5 + $0x4] sm:$0xf]  ;;  %v838_v60 = vor.u32 %v910_v54, %v837_v53 }
  0x3e   : > { %v795_v59 = vld [vmem:[#allocation5 + $0xc] sm:$0xf0]  ;;  %v794_v61 = vor.u32 %v900_v57, %v793_v56  ;;  %v825_v62 = vld [vmem:[#allocation5 + $0x38] sm:$0xf]  ;;  %v907_v63 = vld [vmem:[#allocation5 + $0x40] sm:$0xf0] }
  0x3f   : > { %392 = vmatpush.bf16.msra.mxu0 %v842_v22  ;;  %v798_v0 = vor.u32 %v899_v58, %v795_v59  ;;  %v826_v1 = vor.u32 %v907_v63, %v825_v62  ;;  %v220_v2 = vld [vmem:[%s1306_s23] sm:$0xf]  ;;  %v813_v3 = vld [vmem:[#allocation5 + $0x20] sm:$0xf]  ;;  %v904_v4 = vld [vmem:[#allocation5 + $0x28] sm:$0xf0] }
  0x40   : > { %405 = vmatpush.bf16.msra.mxu1 %v846_v26  ;;  %v814_v5 = vor.u32 %v904_v4, %v813_v3  ;;  %v801_v6 = vld [vmem:[#allocation5 + $0x8] sm:$0xf]  ;;  %v901_v7 = vld [vmem:[#allocation5 + $0x10] sm:$0xf0]  ;;  %v253_v9 = vld [vmem:[#allocation7] sm:$0x7] }
  0x41   : > { %417 = vmatpush.bf16.msra.mxu2 %v862_v42  ;;  %v802_v8 = vor.u32 %v901_v7, %v801_v6  ;;  %v256_v10 = vperm.slane %v253_v9, 1  ;;  %v255_v13 = vperm.slane %v253_v9, 0  ;;  %vm430_vm0 = vcmask 261120   ;;  %s1177_s20 = smov 64   ;;  %s1178_s9 = smov 96  }
  0x42   : > { %s1179_s24 = smov 32   ;;  %v257_v22 = vperm.slane %v253_v9, 2  ;;  %vm467_vm1 = vcmask 1043456   ;;  %vm450_vm2 = vcmask 64512   ;;  %s896_s25 = sshll.u32 %s1224_s19, 2  ;;  %vm668_vm3 = vcmask 523264  }
  0x43   : > { %393 = vmatpush.bf16.msra.mxu0 %v830_v34  ;;  %s685_s28 = scalar_lea.hbm %s1401_s3, %s896_s25  ;;  %vm670_vm4 = vcmask 785408   ;;  %s218_s29 = scalar_lea.vmem [#allocation8], %s787_s21 }
  0x44   : > { %406 = vmatpush.bf16.msra.mxu1 %v834_v37  ;;  %s687_s30 = sshll.u32 %s218_s29, 4  ;;  %s689_s5 = sshll.u32 %s685_s28, 4  ;;  %s688_s30 = int_to_ptr.vmem [resolvable:$true] %s687_s30  ;;  %s690_s5 = int_to_ptr.hbm [resolvable:$true] %s689_s5 }
  0x45   : > { %418 = vmatpush.bf16.msra.mxu2 %v850_v51  ;;  %s675_s19 = scalar_lea.sflag [#allocation4], %s1300_s10  ;;  %s1115_s6 = sshra.s32 %s690_s5, 4  ;;  %s1116_s6 = int_to_ptr.hbm [resolvable:$true] %s1115_s6 }
  0x46   : > { %s1117_s17 = scalar_lea.hbm %s1116_s6, 4  ;;  %s1121_s21 = scalar_lea.hbm %s1401_s3, 8 }
  0x47   : > { %394 = vmatpush.bf16.msra.mxu0 %v818_v43  ;;  %p1118_p1 = scmp.ne.s32.totalorder %s1116_s6, %s1117_s17  ;;  %p1122_p12 = scmp.lt.s32.totalorder %s1116_s6, %s1401_s3 }
  0x48   : > { %407 = vmatpush.bf16.msra.mxu1 %v822_v46  ;;  %p1123_p7 = scmp.lt.s32.totalorder %s1121_s21, %s1117_s17 }
  0x49   : > { %419 = vmatpush.bf16.msra.mxu2 %v838_v60  ;;  %p1119_p3 = pnand %p1118_p1, %p1269_p4 }
  0x4a   : > { %p1124_p8 = por %p1123_p7, %p1122_p12 }
  0x4b   : > { %395 = vmatpush.bf16.msra.mxu0 %v806_v52  ;;  %p1120_p5 = pneg %p1119_p3 }
  0x4c   : > { %408 = vmatpush.bf16.msra.mxu1 %v810_v55 }
  0x4d   : > { %420 = vmatpush.bf16.msra.mxu2 %v826_v1  ;;  %p1125_p9 = pnand %p1124_p8, %p1120_p5 }
  0x4f   : > { %396 = vmatpush.bf16.msra.mxu0 %v794_v61 }
  0x50   : > { %409 = vmatpush.bf16.msra.mxu1 %v798_v0 }
  0x51   : > { %421 = vmatpush.bf16.msra.mxu2 %v814_v5 }
  0x52   : > { %397 = vmatmul.bf16.vlgmr.msra.gmra.mxu0 %v220_v2 }
  0x53   : > { %410 = vmatmul.bf16.vlgmr.msra.gmra.mxu1 %v220_v2 }
  0x55   : > { %422 = vmatpush.bf16.msra.mxu2 %v802_v8 }
  0x58   : > { %423 = vmatmul.bf16.vlgmr.msra.gmra.mxu2 %v220_v2 }
  0xcf   : > { %v398_v11 = vpop.f32.mrf.mxu0 }
  0xd0   : > { %v411_v12 = vpop.f32.mrf.mxu1  ;;  %v399_v16 = vadd.f32 %v398_v11, %v255_v13 }
  0xd1   : > { %v412_v14 = vadd.f32 %v411_v12, %v256_v10 }
  0xd2   : > { %v428_v20 = vpack.c.bf16 %v399_v16, %v399_v16 }
  0xd3   : > { %v429_v15 = vpack.c.bf16 %v412_v14, %v412_v14 }
  0xd5   : > { %545 = vrot.lane.b32.xlu2 %v429_v15, %s1177_s20  ;;  %488 = vrot.lane.b32.xlu1 %v429_v15, %s1178_s9  ;;  %v435_v17 = vsel %vm430_vm0, %v429_v15, 0 }
  0xd6   : > { %444 = vmatpush.bf16.xpose.msra.mxu3 %v435_v17 }
  0xd7   : > { %v400_v18 = vpop.f32.mrf.mxu0 }
  0xd8   : > { %v413_v19 = vpop.f32.mrf.mxu1 }
  0xdb   : > { %v424_v21 = vpop.f32.mrf.mxu2 }
  0xdc   : > { %v425_v23 = vadd.f32 %v424_v21, %v257_v22 }
  0xdd   : > { %601 = vrot.lane.b32.xlu2 %v429_v15, %s1179_s24  ;;  %485 = vrot.lane.b32.xlu1 %v428_v20, %s1178_s9 }
  0xde   : > { %887 = vmatmul.msk.bf16.vlgmr.msra.gmra.mxu3 %vm430_vm0, %v428_v20  ;;  %v1324_v25 = vpack.c.bf16 %v425_v23, %v425_v23 }
  0xe0   : > { %v469_v26 = vsel %vm467_vm1, %v1324_v25, 0 }
  0xe1   : > { %478 = vmatpush.bf16.msrb.mxu3 %v469_v26 }
  0xe3   : > { %v426_v24 = vpop.f32.mrf.mxu2 }
  0xe5   : > { %599 = vrot.lane.b32.xlu1 %v428_v20, %s1179_s24 }
 0x12f   : > { %v546_v27 = vpop.permute.xlu2 %545 }
 0x130   : > { %v551_v28 = vsel %vm430_vm0, %v546_v27, 0 }
 0x131   : > { %560 = vmatpush.bf16.xpose.msrb.mxu1 %v551_v28 }
 0x137   : > { %v602_v42 = vpop.permute.xlu2 %601 }
 0x138   : > { %v607_v44 = vsel %vm430_vm0, %v602_v42, 0 }
 0x147   : > { %v489_v29 = vpop.permute.xlu1 %488 }
 0x148   : > { %v494_v30 = vsel %vm430_vm0, %v489_v29, 0 }
 0x149   : > { %503 = vmatpush.bf16.xpose.msra.mxu3 %v494_v30 }
 0x14f   : > { %v486_v46 = vpop.permute.xlu1 %485 }
 0x157   : > { %v600_v47 = vpop.permute.xlu1 %599 }
 0x161   : > { %v446_v31 = vpop.f32.mrf.mxu3 }
 0x162   : > { %v451_v32 = vsel %vm450_vm2, %v446_v31, -inf }
 0x163   : > { %452 = vmax.xlane.f32.xlu0 %v451_v32 }
 0x169   : > { %v448_v33 = vpop.f32.mrf.mxu3 }
 0x1d6   : > { %v453_v34 = vpop.xlane.xlu0 %452 }
 0x1d7   : > { %v454_v35 = vsub.f32 %v446_v31, %v453_v34 }
 0x1d9   : > { %v455_v36 = vmul.f32 1.442695, %v454_v35 }
 0x1db   : > { %995 = vpow2.f32 %v455_v36 }
 0x1e1   : > { %v996_v37 = vpop.eup %995 }
 0x1e2   : > { %v457_v38 = vsel %vm450_vm2, %v996_v37, 0.0 }
 0x1e3   : > { %458 = vadd.xlane.f32.xlu0 %v457_v38 }
 0x1f7   : > { %543 = vrot.lane.b32.xlu0 %v428_v20, %s1177_s20 }
 0x256   : > { %v459_v39 = vpop.xlane.xlu0 %458 }
 0x257   : > { %997 = vrcp.f32 %v459_v39 }
 0x25d   : > { %v998_v40 = vpop.eup %997 }
 0x25e   : > { %v461_v41 = vmul.f32 %v998_v40, %v996_v37 }
 0x260   : > { %v462_v43 = vpack.c.bf16 %v461_v41, %v461_v41 }
 0x262   : > { %888 = vmatmul.msk.bf16.vlgmr.msrb.gmra.mxu3 %vm450_vm2, %v462_v43 }
 0x263   : > { %616 = vmatpush.bf16.xpose.msrb.mxu3 %v607_v44 }
 0x269   : > { %v544_v45 = vpop.permute.xlu0 %543 }
 0x26a   : > { %891 = vmatmul.msk.bf16.vlgmr.msrb.gmra.mxu1 %vm430_vm0, %v544_v45 }
 0x272   : > { %889 = vmatmul.msk.bf16.vlgmr.msra.gmra.mxu3 %vm430_vm0, %v486_v46 }
 0x282   : > { %893 = vmatmul.msk.bf16.vlgmr.msrb.gmra.mxu3 %vm430_vm0, %v600_v47 }
 0x2e5   : > { %v1338_v48 = vpop.f32.mrf.mxu3 }
 0x2e7   : > { %v562_v49 = vpop.f32.mrf.mxu1 }
 0x2e8   : > { %v566_v50 = vsel %vm450_vm2, %v562_v49, -inf }
 0x2e9   : > { %567 = vmax.xlane.f32.xlu1 %v566_v50 }
 0x2ed   : > { %v482_v51 = vpop.f32.mrf.mxu3 }
 0x2ef   : > { %v564_v52 = vpop.f32.mrf.mxu1 }
 0x2f5   : > { %v505_v53 = vpop.f32.mrf.mxu3 }
 0x2f6   : > { %v509_v54 = vsel %vm450_vm2, %v505_v53, -inf }
 0x2f7   : > { %510 = vmax.xlane.f32.xlu2 %v509_v54 }
 0x2fd   : > { %v507_v55 = vpop.f32.mrf.mxu3 }
 0x305   : > { %v618_v56 = vpop.f32.mrf.mxu3 }
 0x306   : > { %v622_v57 = vsel %vm450_vm2, %v618_v56, -inf }
 0x307   : > { %623 = vmax.xlane.f32.xlu0 %v622_v57 }
 0x30d   : > { %v620_v58 = vpop.f32.mrf.mxu3 }
 0x31b   : > { %578 = vrot.lane.b32.xlu0 %v1324_v25, %s1177_s20 }
 0x35c   : > { %v568_v59 = vpop.xlane.xlu1 %567 }
 0x35d   : > { %v569_v60 = vsub.f32 %v562_v49, %v568_v59 }
 0x35f   : > { %v570_v61 = vmul.f32 1.442695, %v569_v60 }
 0x361   : > { %999 = vpow2.f32 %v570_v61 }
 0x367   : > { %v1000_v62 = vpop.eup %999 }
 0x368   : > { %v572_v63 = vsel %vm450_vm2, %v1000_v62, 0.0 }
 0x369   : > { %573 = vadd.xlane.f32.xlu1 %v572_v63 }
 0x36a   : > { %v511_v0 = vpop.xlane.xlu2 %510 }
 0x36b   : > { %v512_v1 = vsub.f32 %v505_v53, %v511_v0 }
 0x36d   : > { %v513_v2 = vmul.f32 1.442695, %v512_v1 }
 0x36f   : > { %1001 = vpow2.f32 %v513_v2 }
 0x375   : > { %v1002_v3 = vpop.eup %1001 }
 0x376   : > { %v515_v4 = vsel %vm450_vm2, %v1002_v3, 0.0 }
 0x377   : > { %516 = vadd.xlane.f32.xlu2 %v515_v4 }
 0x37a   : > { %v624_v5 = vpop.xlane.xlu0 %623 }
 0x37b   : > { %v625_v6 = vsub.f32 %v618_v56, %v624_v5 }
 0x37d   : > { %v626_v7 = vmul.f32 1.442695, %v625_v6 }
 0x37f   : > { %1003 = vpow2.f32 %v626_v7 }
 0x385   : > { %v1004_v8 = vpop.eup %1003 }
 0x386   : > { %v628_v9 = vsel %vm450_vm2, %v1004_v8, 0.0 }
 0x387   : > { %629 = vadd.xlane.f32.xlu1 %v628_v9 }
 0x38d   : > { %v579_v10 = vpop.permute.xlu0 %578 }
 0x38e   : > { %v584_v11 = vsel %vm467_vm1, %v579_v10, 0 }
 0x38f   : > { %522 = vrot.lane.b32.xlu2 %v1324_v25, %s1178_s9  ;;  %593 = vmatpush.bf16.msrb.mxu2 %v584_v11 }
 0x3a0   : > { %634 = vrot.lane.b32.xlu1 %v1324_v25, %s1179_s24 }
 0x3dc   : > { %v574_v12 = vpop.xlane.xlu1 %573 }
 0x3dd   : > { %1005 = vrcp.f32 %v574_v12 }
 0x3e3   : > { %v1006_v13 = vpop.eup %1005 }
 0x3e4   : > { %v576_v14 = vmul.f32 %v1006_v13, %v1000_v62 }
 0x3e6   : > { %v577_v15 = vpack.c.bf16 %v576_v14, %v576_v14 }
 0x3e8   : > { %892 = vmatmul.msk.bf16.vlgmr.msrb.gmra.mxu2 %vm450_vm2, %v577_v15 }
 0x3ea   : > { %v517_v16 = vpop.xlane.xlu2 %516 }
 0x3eb   : > { %1007 = vrcp.f32 %v517_v16 }
 0x3f1   : > { %v1008_v17 = vpop.eup %1007 }
 0x3f2   : > { %v519_v18 = vmul.f32 %v1008_v17, %v1002_v3  ;;  %v523_v19 = vpop.permute.xlu2 %522 }
 0x3f3   : > { %v528_v20 = vsel %vm467_vm1, %v523_v19, 0 }
 0x3f4   : > { %537 = vmatpush.bf16.msrb.mxu0 %v528_v20  ;;  %v520_v21 = vpack.c.bf16 %v519_v18, %v519_v18 }
 0x3f7   : > { %890 = vmatmul.msk.bf16.vlgmr.msrb.gmra.mxu0 %vm450_vm2, %v520_v21 }
 0x3fa   : > { %v630_v22 = vpop.xlane.xlu1 %629 }
 0x3fb   : > { %1009 = vrcp.f32 %v630_v22 }
 0x401   : > { %v1010_v23 = vpop.eup %1009 }
 0x402   : > { %v632_v24 = vmul.f32 %v1010_v23, %v1004_v8 }
 0x404   : > { %v633_v27 = vpack.c.bf16 %v632_v24, %v632_v24 }
 0x412   : > { %v635_v25 = vpop.permute.xlu1 %634 }
 0x413   : > { %v640_v26 = vsel %vm467_vm1, %v635_v25, 0 }
 0x414   : > { %649 = vmatpush.bf16.msra.mxu0 %v640_v26 }
 0x417   : > { %894 = vmatmul.msk.bf16.vlgmr.msra.gmra.mxu0 %vm450_vm2, %v633_v27 }
 0x46b   : > { %v595_v28 = vpop.f32.mrf.mxu2 }
 0x473   : > { %v597_v29 = vpop.f32.mrf.mxu2 }
 0x474   : > { %v539_v30 = vpop.f32.mrf.mxu0 }
 0x475   : > { %656 = vrot.lane.b32.xlu2 %v539_v30, %s1179_s24 }
 0x47c   : > { %v541_v31 = vpop.f32.mrf.mxu0 }
 0x47d   : > { %660 = vrot.lane.b32.xlu2 %v595_v28, %s1177_s20 }
 0x494   : > { %v651_v32 = vpop.f32.mrf.mxu0 }
 0x495   : > { %664 = vrot.lane.b32.xlu0 %v651_v32, %s1178_s9 }
 0x49c   : > { %v653_v33 = vpop.f32.mrf.mxu0 }
 0x4cf   : > { %v657_v34 = vpop.permute.xlu2 %656 }
 0x4d0   : > { %v667_v36 = vsel %vm430_vm0, %v1338_v48, %v657_v34 }
 0x4d7   : > { %v661_v35 = vpop.permute.xlu2 %660 }
 0x4d8   : > { %v669_v37 = vsel %vm668_vm3, %v667_v36, %v661_v35 }
 0x507   : > { %v665_v38 = vpop.permute.xlu0 %664 }
 0x508   : > { %v671_v39 = vsel %vm670_vm4, %v669_v37, %v665_v38 }
 0x509   : > { %v672_v40 = vpack.c.bf16 %v671_v39, %v671_v39 }
 0x50b   : > { %673 = vst [vmem:[%s218_s29] sm:$0xf] %v672_v40 }
 0x50c   : > { %1128 = shalt.err (!%p1125_p9)
}
 0x50d   : > { %933 = dma.vmem_to_hbm [thread:$0]  (%p1269_p4), %s688_s30, 64, %s690_s5, %s675_s19  }
 0x50e PF: > { %s701_s10 = sand.u32 1, %s1159_s12   ;;  %p1408_p10 = scmp.ge.s32.totalorder %s1171_s15, 2 }
 0x50f   : > { %s702_s20 = scalar_lea.sflag [#allocation4], %s701_s10 }
 0x510   : > { %p947_p13 = pnand %p1408_p10, %p1273_p6 }
 0x512   : > { %p948_p11 = pneg %p947_p13 }
 0x514   : > { %1154 = dma.done.wait (%p948_p11), %s702_s20, 64  }
 0x515   : > { %1156 = vsyncadd (%p948_p11), %s702_s20, 4294967232  ;;  %p17_p0 = scmp.ge.s32.totalorder %s1243_s4, 4   ;;  %s1409_s12 = smov %s1163_s13 }
 0x516   : > { %s1410_s13 = smov %s1167_s14  ;;  %s1411_s14 = smov %s1254_s7 }
 0x517   : > { %s1412_s15 = smov %s1243_s4  ;;  %19 = sbr.rel (!%p17_p0) target bundleno = 6 (0x6), region = 85 }
 0x51c   :  { %708 = vsyncpa [#allocation3], 1 }
 0x51d   :  { %710 = vsyncpa [#allocation3 + $0x1], 1 }
 0x51e   :  { %711 = vsyncpa [#allocation6], 1 }
 0x51f   :  { %712 = vsyncpa [#allocation4], 1 }
 0x520   :  { %714 = vsyncpa [#allocation4 + $0x1], 1 }

</bundles_post_ra>
